<compile_context>
chip_gen: v7x
topology: tpu7x:2x2x1
jax: 0.10.0
libtpu: 0.0.40
codegen_flags: <defaults>
</compile_context>

<pallas_src>
import functools

import jax
import jax.numpy as jnp
from jax.experimental import pallas as pl
from jax.experimental.pallas import tpu as pltpu


def _cross_entropy_kernel(pred_ref, label_ref, out_ref, *, batch, tile_b, exact_fit):
    # Per-tile f32 cast (HBM traffic stays in the input's native dtype).
    pred = pred_ref[...].astype(jnp.float32)          # (tile_b, C)
    labels = label_ref[...]                           # (tile_b, 1) int32

    # Stable shift; `pred` is dead after this line (reduces VMEM/vreg pressure).
    m = jnp.max(pred, axis=-1, keepdims=True)                       # (tile_b, 1)
    shifted = pred - m                                               # (tile_b, C)

    # pred[label] via iota compare + masked row-sum (no one-hot materialization).
    cls_idx = jax.lax.broadcasted_iota(jnp.int32, shifted.shape, 1)  # (tile_b, C)
    true_shifted = jnp.sum(jnp.where(cls_idx == labels, shifted, 0.0),
                           axis=-1, keepdims=True)                   # (tile_b, 1)

    lse_shifted = jnp.log(jnp.sum(jnp.exp(shifted), axis=-1, keepdims=True))

    # The `m` terms cancel: lse_shifted - true_shifted == logsumexp(pred) - pred[label].
    loss = lse_shifted - true_shifted                                 # (tile_b, 1)

    if not exact_fit:
        # Padded rows of the last tile read uninitialized VMEM; exp/max there may
        # produce inf/NaN.  A SELECT-based where discards them safely — keep it a
        # select, never arithmetic (multiply-by-zero) masking.
        row = (pl.program_id(0) * tile_b
               + jax.lax.broadcasted_iota(jnp.int32, (tile_b, 1), 0))
        loss = jnp.where(row < batch, loss, 0.0)

    # Lane-dense partial sum for this tile (final reduction + /b in the wrapper).
    partial = jnp.sum(loss)
    out_ref[...] = jnp.full(out_ref.shape, partial, dtype=jnp.float32)


def _choose_tile_b(b, num_class, itemsize):
    """Pick a tile row count (multiple of 8) that fits VMEM and feeds both v7x cores."""
    padded_c = ((max(num_class, 1) + 127) // 128) * 128  # lane padding to 128

    # Per-row bytes live in one grid step:
    #   2x double-buffered native-dtype input + f32 cast temp + ~1 f32 intermediate.
    bytes_per_row = 2 * itemsize * padded_c + 2 * 4 * padded_c
    budget = 24 * 1024 * 1024                      # per-step working-set budget
    vmem_rows = max(8, (budget // bytes_per_row) // 8 * 8)

    if b >= 16:
        # Guarantee >= 2 grid tiles so the "parallel" axis shards across v7x's
        # two TensorCores (harmless on single-TC v5e/v6e).
        core_cap = ((-(-b // 2)) + 7) // 8 * 8     # round_up(ceil(b/2), 8)
    else:
        core_cap = max(8, (b // 8) * 8)

    return int(max(8, min(core_cap, vmem_rows, 4096)))


def cross_entropy_pallas(y_pred, y):
    """y_pred: (b, num_class) float, y: (b,) integer labels -> scalar f32 loss."""
    b, num_class = y_pred.shape
    labels = y.astype(jnp.int32).reshape(b, 1)

    tile_b = _choose_tile_b(b, num_class, jnp.dtype(y_pred.dtype).itemsize)
    num_tiles = pl.cdiv(b, tile_b)
    exact_fit = (b % tile_b == 0)

    kernel = functools.partial(
        _cross_entropy_kernel, batch=b, tile_b=tile_b, exact_fit=exact_fit)

    partials = pl.pallas_call(
        kernel,
        out_shape=jax.ShapeDtypeStruct((num_tiles, 8, 128), jnp.float32),
        grid=(num_tiles,),
        in_specs=[
            pl.BlockSpec((tile_b, num_class), lambda i: (i, 0)),  # logits tile
            pl.BlockSpec((tile_b, 1), lambda i: (i, 0)),          # labels tile
        ],
        out_specs=pl.BlockSpec((1, 8, 128), lambda i: (i, 0, 0)),
        compiler_params=pltpu.CompilerParams(
            dimension_semantics=("parallel",),
            vmem_limit_bytes=48 * 1024 * 1024,   # <= v7x's 64 MiB physical VMEM
        ),
    )(y_pred, labels)

    # One reduction + one divide by a trace-time constant in the wrapper.
    return jnp.sum(partials[:, 0, 0]) / b


def cross_entropy_ref(y_pred, y):
    """Pure-JAX reference mirroring the PyTorch forward (inputs kept small so the
    unstabilized softmax of the original module cannot overflow)."""
    b, num_class = y_pred.shape
    one_hot = jax.nn.one_hot(y, num_class, dtype=jnp.float32)
    logits = y_pred.astype(jnp.float32)
    e = jnp.exp(logits)
    softmax = e / jnp.sum(e, axis=-1, keepdims=True)
    loss = -jnp.log(jnp.sum(softmax * one_hot, axis=-1))
    return jnp.mean(loss)


if __name__ == "__main__":
    key = jax.random.PRNGKey(0)
    k1, k2, k3, k4, k5, k6 = jax.random.split(key, 6)

    # Case 1: shapes implied by the module (batch=8, num_class=32), exact tile fit.
    y_pred1 = jax.random.normal(k1, (8, 32), dtype=jnp.float32)
    y1 = jax.random.randint(k2, (8,), 0, 32, dtype=jnp.int32)
    loss1 = cross_entropy_pallas(y_pred1, y1)
    jax.block_until_ready(loss1)
    ref1 = cross_entropy_ref(y_pred1, y1)
    assert jnp.allclose(loss1, ref1, atol=1e-5, rtol=1e-5), (loss1, ref1)

    # Case 2: batch not a multiple of the tile (exercises padded-row masking).
    y_pred2 = jax.random.normal(k3, (20, 10), dtype=jnp.float32)
    y2 = jax.random.randint(k4, (20,), 0, 10, dtype=jnp.int32)
    loss2 = cross_entropy_pallas(y_pred2, y2)
    jax.block_until_ready(loss2)
    ref2 = cross_entropy_ref(y_pred2, y2)
    assert jnp.allclose(loss2, ref2, atol=1e-5, rtol=1e-5), (loss2, ref2)

    # Case 3: b >= 16 exact fit across two tiles (v7x megacore split path),
    # bf16 input exercising the dtype-aware budget + in-kernel f32 cast.
    y_pred3 = jax.random.normal(k5, (32, 64), dtype=jnp.bfloat16)
    y3 = jax.random.randint(k6, (32,), 0, 64, dtype=jnp.int32)
    loss3 = cross_entropy_pallas(y_pred3, y3)
    jax.block_until_ready(loss3)
    ref3 = cross_entropy_ref(y_pred3, y3)
    assert jnp.allclose(loss3, ref3, atol=2e-3, rtol=2e-3), (loss3, ref3)

    print("KERNEL_OK")
</pallas_src>

<mosaic_0001>
module attributes {stable_mosaic.version = 11 : i64} {
  func.func @_cross_entropy_kernel(%arg0: i32, %arg1: memref<8x32xf32, #tpu.memory_space<vmem>>, %arg2: memref<8x1xi32, #tpu.memory_space<vmem>>, %arg3: memref<1x8x128xf32, #tpu.memory_space<vmem>>) attributes {dimension_semantics = [#tpu.dimension_semantics<parallel>], iteration_bounds = array<i64: 1>, scalar_prefetch = 0 : i64, scratch_operands = 0 : i64, tpu.core_type = #tpu.core_type<tc>, window_params = [{transform_indices = @transform_0, window_bounds = array<i64: 8, 32>}, {transform_indices = @transform_1, window_bounds = array<i64: 8, 1>}, {transform_indices = @transform_2, window_bounds = array<i64: 1, 8, 128>}]} {
    %c0 = arith.constant 0 : index
    %c0_0 = arith.constant 0 : index
    %0 = vector.load %arg1[%c0, %c0_0] : memref<8x32xf32, #tpu.memory_space<vmem>>, vector<8x32xf32>
    %c0_1 = arith.constant 0 : index
    %c0_2 = arith.constant 0 : index
    %1 = vector.load %arg2[%c0_1, %c0_2] : memref<8x1xi32, #tpu.memory_space<vmem>>, vector<8x1xi32>
    %cst = arith.constant dense<0xFF800000> : vector<8xf32>
    %2 = vector.multi_reduction <maximumf>, %0, %cst [1] : vector<8x32xf32> to vector<8xf32>
    %3 = vector.shape_cast %2 : vector<8xf32> to vector<8x1xf32>
    %4 = vector.broadcast %3 : vector<8x1xf32> to vector<8x32xf32>
    %5 = arith.subf %0, %4 : vector<8x32xf32>
    %6 = tpu.iota {dimensions = array<i32: 1>} : vector<8x32xi32>
    %7 = vector.broadcast %1 : vector<8x1xi32> to vector<8x32xi32>
    %8 = arith.cmpi eq, %6, %7 : vector<8x32xi32>
    %cst_3 = arith.constant 0.000000e+00 : f32
    %9 = vector.broadcast %cst_3 : f32 to vector<8x32xf32>
    %10 = arith.select %8, %5, %9 : vector<8x32xi1>, vector<8x32xf32>
    %cst_4 = arith.constant dense<0.000000e+00> : vector<8xf32>
    %11 = vector.multi_reduction <add>, %10, %cst_4 [1] : vector<8x32xf32> to vector<8xf32>
    %12 = vector.shape_cast %11 : vector<8xf32> to vector<8x1xf32>
    %13 = math.exp %5 : vector<8x32xf32>
    %cst_5 = arith.constant dense<0.000000e+00> : vector<8xf32>
    %14 = vector.multi_reduction <add>, %13, %cst_5 [1] : vector<8x32xf32> to vector<8xf32>
    %15 = vector.shape_cast %14 : vector<8xf32> to vector<8x1xf32>
    %16 = math.log %15 : vector<8x1xf32>
    %17 = arith.subf %16, %12 : vector<8x1xf32>
    %18 = vector.shape_cast %17 : vector<8x1xf32> to vector<1x8x1xf32>
    %cst_6 = arith.constant dense<0.000000e+00> : vector<1xf32>
    %19 = vector.multi_reduction <add>, %18, %cst_6 [1, 2] : vector<1x8x1xf32> to vector<1xf32>
    %20 = vector.shape_cast %19 : vector<1xf32> to vector<1x1x1xf32>
    %21 = vector.extract %20[0, 0, 0] : f32 from vector<1x1x1xf32>
    %22 = vector.broadcast %21 : f32 to vector<1x8x128xf32>
    %c0_7 = arith.constant 0 : index
    %c0_8 = arith.constant 0 : index
    %c0_9 = arith.constant 0 : index
    %23 = vector.load %arg3[%c0_7, %c0_8, %c0_9] : memref<1x8x128xf32, #tpu.memory_space<vmem>>, vector<1x8x128xf32>
    tpu.vector_store %arg3[%c0_7, %c0_8, %c0_9], %22 {strides = array<i32>} : memref<1x8x128xf32, #tpu.memory_space<vmem>>, vector<1x8x128xf32>,
    return
  }
  func.func @transform_0(%arg0: i32) -> (i32, i32) {
    %c0_i32 = arith.constant 0 : i32
    %c0_i32_0 = arith.constant 0 : i32
    return %arg0, %c0_i32 : i32, i32
  }
  func.func @transform_1(%arg0: i32) -> (i32, i32) {
    %c0_i32 = arith.constant 0 : i32
    %c0_i32_0 = arith.constant 0 : i32
    return %arg0, %c0_i32 : i32, i32
  }
  func.func @transform_2(%arg0: i32) -> (i32, i32, i32) {
    %c0_i32 = arith.constant 0 : i32
    %c0_i32_0 = arith.constant 0 : i32
    %c0_i32_1 = arith.constant 0 : i32
    return %arg0, %c0_i32, %c0_i32_0 : i32, i32, i32
  }
}

</mosaic_0001>

<bundles_post_ra>
// kernel: tpu_custom_call.1
= control target key start
LH: loop header
LB: loop body
LE: loop exit
PB: predicated region body
PF: predicated region fallthrough
CT: control target
= control target key end

     0   :  { %vm14_vm0 = vcmask 261120   ;;  %s135_s0 = inlined_call_operand.vmem [shape: f32[8,32], index: 0, kind: input, shape index: {}]   ;;  %s136_s1 = inlined_call_operand.vmem [shape: s32[8,1], index: 1, kind: input, shape index: {}]   ;;  %s137_s2 = inlined_call_operand.hbm [shape: f32[1,8,128], index: 2, kind: output, shape index: {}]  }
   0x1   :  { %v12_v0 = vld [vmem:[%s135_s0] sm:$0xff] }
   0x2   :  { %7 = vsyncpa [#allocation3], 0  ;;  %v15_v1 = vsel %vm14_vm0, %v12_v0, -inf  ;;  %v97_v2 = vmov 0   ;;  %v13_v3 = vld [vmem:[%s136_s1] sm:$0xff]  ;;  %v19_v7 = vlaneseq  ;;  %vm37_vm2 = vcmask 7168  }
   0x3   :  { %68 = vset.pattern.permute.xlu0 %v97_v2  ;;  %s98_s0 = smov [#allocation2]  }
   0x4   :  { %16 = vmax.xlane.f32.xlu0 %v15_v1  ;;  %v20_v8 = vand.u32 127, %v19_v7  ;;  %s56_s1 = sshll.u32 %s98_s0, 4  ;;  %s57_s1 = int_to_ptr.vmem [resolvable:$true] %s56_s1 }
   0x5   :  { %s73_s14 = scalar_lea.vmem %s57_s1, 128  ;;  %p78_p1 = scmp.lt.s32.totalorder %s57_s1, %s57_s1 }
   0x6   :  { %p74_p0 = scmp.ne.s32.totalorder %s57_s1, %s73_s14  ;;  %p79_p2 = scmp.lt.s32.totalorder %s73_s14, %s73_s14 }
   0x8   :  { %p80_p3 = por %p79_p2, %p78_p1 }
   0xa   :  { %p81_p4 = pnand %p80_p3, %p74_p0 }
  0x1a   :  { %22 = vperm.xlu0 %68, %v13_v3  }
  0x91   :  { %v17_v4 = vpop.xlane.xlu0 %16 }
  0x92   :  { %v18_v5 = vsub.f32 %v12_v0, %v17_v4 }
  0x94   :  { %v29_v6 = vmul.f32 1.442695, %v18_v5 }
  0x96   :  { %69 = vpow2.f32 %v29_v6 }
  0x99   :  { %v23_v9 = vpop.permute.xlu0 %22 }
  0x9a   :  { %vm24_vm1 = vcmp.eq.s32.totalorder %v20_v8, %v23_v9 }
  0x9b   :  { %v25_v12 = vsel %vm24_vm1, %v18_v5, 0.0 }
  0x9c   :  { %v26_v13 = vsel %vm14_vm0, %v25_v12, 0.0 }
  0xa0   :  { %v70_v10 = vpop.eup %69 }
  0xa1   :  { %v31_v11 = vsel %vm14_vm0, %v70_v10, 0.0 }
  0xa2   :  { %32 = vadd.xlane.f32.xlu1 %v31_v11 }
  0xa6   :  { %27 = vadd.xlane.f32.xlu1 %v26_v13 }
 0x12f   :  { %v33_v14 = vpop.xlane.xlu1 %32 }
 0x130   :  { %71 = vlog2.f32 %v33_v14 }
 0x133   :  { %v28_v17 = vpop.xlane.xlu1 %27 }
 0x13a   :  { %v72_v15 = vpop.eup %71 }
 0x13b   :  { %v35_v16 = vmul.f32 0.6931472, %v72_v15 }
 0x13d   :  { %v36_v18 = vsub.f32 %v35_v16, %v28_v17 }
 0x13f   :  { %v38_v19 = vsel %vm37_vm2, %v36_v18, 0.0 }
 0x140   :  { %39 = vadd.xlane.f32.xlu1 %v38_v19 }
 0x1cd   :  { %v40_v20 = vpop.xlane.xlu1 %39 }
 0x1ce   :  { %v41_v21 = vrot.slane %v40_v20, 4 }
 0x1d0   :  { %v42_v22 = vadd.f32 %v41_v21, %v40_v20 }
 0x1d2   :  { %v43_v23 = vrot.slane %v42_v22, 2 }
 0x1d4   :  { %v44_v24 = vadd.f32 %v43_v23, %v42_v22 }
 0x1d6   :  { %v45_v25 = vrot.slane %v44_v24, 1 }
 0x1d8   :  { %v46_v26 = vadd.f32 %v45_v25, %v44_v24 }
 0x1da   :  { %64 = vpush %v46_v26 }
 0x20b   :  { %s65_s13 = spop %64 }
 0x20c   :  { %v48_v27 = vstv %s65_s13 }
 0x20d   :  { %49 = vst [vmem:[#allocation2] sm:$0xff] %v48_v27 }
 0x20e   :  { %84 = shalt.err (!%p81_p4)
}
 0x20f   :  { %s85_s17 = scalar_lea.hbm %s137_s2, 128 }
 0x210   :  { %p86_p5 = scmp.ne.s32.totalorder %s137_s2, %s85_s17  ;;  %p89_p6 = scmp.lt.u32.totalorder %s85_s17, %s137_s2 }
 0x212   :  { %p91_p7 = pnand %p89_p6, %p86_p5 }
 0x214   :  { %94 = shalt.err (!%p91_p7)
}
 0x215   :  { %59 = dma.vmem_to_hbm [thread:$0]  %s57_s1, 128, %s137_s2, [#allocation3]  }
 0x216   :  { %95 = dma.done.wait [#allocation3], 128  }
 0x217   :  { %96 = vsyncadd [#allocation3], 4294967168 }
 0x218   :  { %63 = vsyncpa [#allocation3], 1 }

</bundles_post_ra>
